<compile_context>
chip_gen: v7x
topology: tpu7x:2x2x1
jax: 0.10.0
libtpu: 0.0.40
codegen_flags: <defaults>
</compile_context>

<pallas_src>
import math
from functools import partial

import jax
import jax.numpy as jnp
from jax.experimental import pallas as pl
from jax.experimental.pallas import tpu as pltpu


def _round_up(a: int, b: int) -> int:
    return ((a + b - 1) // b) * b


def _pick_q_tile(seq_len: int, max_tile: int = 128) -> int:
    """Query tile: multiple of 8, capped at max_tile.  128 keeps the (TQ, L) f32
    footprints small enough for v7x's 64 MiB VMEM while still filling the MXU M dim.
    The sequence is padded up to a multiple of the tile, so awkward L never degenerates
    into an untiled TQ = L variant."""
    if seq_len <= max_tile:
        return _round_up(seq_len, 8)
    return max_tile


def _pick_head_group(num_heads: int, head_dim: int, q_tile: int, seq_len: int,
                     lane_target: int = 256, f32_budget: int = 12 * 1024 * 1024) -> int:
    """Largest divisor G of num_heads such that G*head_dim <= lane_target (fills MXU /
    vreg lanes) and the (G, TQ, L) f32 softmax intermediates stay within a VMEM budget."""
    best = 1
    for g in range(1, num_heads + 1):
        if num_heads % g:
            continue
        if g * head_dim > max(lane_target, head_dim):
            continue
        if g > 1 and 3 * g * q_tile * seq_len * 4 > f32_budget:
            continue
        best = g
    return best


def _mha_core_kernel(q_ref, k_ref, v_ref, wo_ref, bo_ref,
                     val_ref, wgt_ref, acc_ref,
                     *, num_groups, group, inv_heads):
    """One grid step = (batch b, query tile qi, head-group hg).

    hg is the innermost *reduction* axis: the out-projection and the head-averaged
    attention weights accumulate across it (pl.when init / finalize, f32 scratch).
    q_ref:  (G, TQ, hd)   -- pre-projected, 1/sqrt(hd) already folded in
    k_ref:  (H, L, hd)    -- resident for all heads (fetched once per batch row)
    v_ref:  (H, L, hd)
    wo_ref: (NG, G*hd, E) -- resident for the whole grid
    bo_ref: (1, E)
    """
    hg = pl.program_id(2)
    cdt = q_ref.dtype                      # bf16-friendly MXU operand dtype

    @pl.when(hg == 0)
    def _init():
        acc_ref[...] = jnp.zeros_like(acc_ref)
        wgt_ref[...] = jnp.zeros_like(wgt_ref)

    h0 = pl.multiple_of(hg * group, group)
    q = q_ref[...]                         # (G, TQ, hd)
    k = k_ref[pl.ds(h0, group)]            # (G, L,  hd)
    v = v_ref[pl.ds(h0, group)]            # (G, L,  hd)

    # Scores (batched over the head group) and f32 softmax.
    s = jnp.einsum('gqd,gkd->gqk', q, k, preferred_element_type=jnp.float32)  # (G,TQ,L)
    s = s - jnp.max(s, axis=-1, keepdims=True)
    e = jnp.exp(s)
    p = e * pl.reciprocal(jnp.sum(e, axis=-1, keepdims=True), approx=True)    # (G,TQ,L)

    o = jnp.einsum('gqk,gkd->gqd', p.astype(cdt), v,
                   preferred_element_type=jnp.float32)                        # (G,TQ,hd)

    # Concatenate the group's heads along lanes -> one wide (TQ, G*hd) x (G*hd, E)
    # out-projection matmul, accumulated across head groups in f32 scratch.
    if group > 1:
        o_wide = jnp.concatenate([o[g] for g in range(group)], axis=-1)       # (TQ, G*hd)
    else:
        o_wide = o[0]
    acc_ref[...] += jnp.dot(o_wide.astype(cdt), wo_ref[hg],
                            preferred_element_type=jnp.float32)               # (TQ, E)

    # Head-averaged attention weights: fold 1/H into the per-step accumulation so no
    # extra full (TQ, L) elementwise sweep is needed at finalize.
    wgt_ref[...] += jnp.sum(p, axis=0) * inv_heads

    @pl.when(hg == num_groups - 1)
    def _finalize():
        val_ref[...] = (acc_ref[...] + bo_ref[...]).astype(val_ref.dtype)


def attention_forward(x, in_proj_weight, in_proj_bias, out_proj_weight, out_proj_bias,
                      num_heads, *, compute_dtype=None):
    """Forward pass of MaskGit `Attention` (self-attention, q = k = v = x).

    x:               (B, L, E)   batch_first layout
    in_proj_weight:  (3E, E)     packed torch layout
    in_proj_bias:    (3E,)
    out_proj_weight: (E, E)      torch layout
    out_proj_bias:   (E,)
    returns (attention_value (B, L, E) in x.dtype,
             attention_weight (B, L, L) float32, averaged over heads)
    """
    B, L, E = x.shape
    H = num_heads
    assert E % H == 0, "embed_dim must be divisible by num_heads"
    hd = E // H
    scale = 1.0 / math.sqrt(hd)

    # bf16 MXU operands for f32 inputs (f32 accumulation / f32 softmax everywhere).
    if compute_dtype is None:
        cdt = jnp.bfloat16 if x.dtype == jnp.float32 else x.dtype
    else:
        cdt = compute_dtype

    # ---- fused, full-width QKV projection hoisted to XLA --------------------------
    # One (B*L, E) x (E, 3E) matmul; 1/sqrt(hd) folded into the Q columns / bias.
    w_in_t = jnp.transpose(in_proj_weight).astype(jnp.float32)                # (E, 3E)
    col_scale = jnp.concatenate([jnp.full((E,), scale, jnp.float32),
                                 jnp.ones((2 * E,), jnp.float32)])
    w_in_t = w_in_t * col_scale[None, :]
    b_in = in_proj_bias.astype(jnp.float32) * col_scale

    qkv = jnp.dot(x.reshape(B * L, E).astype(cdt), w_in_t.astype(cdt),
                  preferred_element_type=jnp.float32) + b_in[None, :]
    qkv = qkv.reshape(B, L, 3, H, hd)
    q = jnp.transpose(qkv[:, :, 0], (0, 2, 1, 3)).astype(cdt)                 # (B,H,L,hd)
    k = jnp.transpose(qkv[:, :, 1], (0, 2, 1, 3)).astype(cdt)
    v = jnp.transpose(qkv[:, :, 2], (0, 2, 1, 3)).astype(cdt)

    # ---- tiling --------------------------------------------------------------------
    TQ = _pick_q_tile(L)
    Lp = _round_up(L, TQ)
    n_q = Lp // TQ
    if Lp != L:                                   # pad queries only; keys stay length L
        q = jnp.pad(q, ((0, 0), (0, 0), (0, Lp - L), (0, 0)))
    G = _pick_head_group(H, hd, TQ, L)
    NG = H // G

    # Out-projection parameters, VMEM-resident for the whole grid (constant index_map).
    wo_g = jnp.transpose(out_proj_weight).reshape(NG, G * hd, E).astype(cdt)  # (NG,G*hd,E)
    bo = out_proj_bias.reshape(1, E).astype(jnp.float32)

    # ---- VMEM budget / cost hints ---------------------------------------------------
    cs = jnp.dtype(cdt).itemsize
    os_ = jnp.dtype(x.dtype).itemsize
    blk_bytes = (G * TQ * hd * cs            # q tile
                 + 2 * H * L * hd * cs       # resident K, V
                 + E * E * cs + E * 4        # resident Wo, bo
                 + TQ * E * os_              # value output block
                 + TQ * L * 4)               # weight output block
    f32_tmp = 4 * G * TQ * L * 4 + 2 * TQ * E * 4 + G * TQ * E * 4
    est = 2 * blk_bytes + f32_tmp + TQ * E * 4
    try:
        phys = int(pltpu.get_tpu_info().vmem_capacity_bytes)
    except Exception:
        phys = 64 * 1024 * 1024              # conservative (v7x per-TC) fallback
    vmem_limit = int(min(max(2 * est + (8 << 20), 32 << 20), (phys * 3) // 4))

    cost = pl.CostEstimate(
        flops=4 * B * Lp * L * E + 2 * B * Lp * E * E,        # QK^T + PV + out-proj
        transcendentals=B * H * Lp * L,
        bytes_accessed=(B * H * Lp * hd * cs                  # q
                        + 2 * B * H * L * hd * cs             # k, v (once per batch row)
                        + E * E * cs + E * 4                  # resident weights
                        + B * Lp * E * os_                    # attention_value
                        + B * Lp * L * 4),                    # attention_weight (f32)
    )

    kernel = partial(_mha_core_kernel, num_groups=NG, group=G, inv_heads=1.0 / H)

    val, wgt = pl.pallas_call(
        kernel,
        out_shape=(jax.ShapeDtypeStruct((B, Lp, E), x.dtype),
                   jax.ShapeDtypeStruct((B, Lp, L), jnp.float32)),
        grid=(B, n_q, NG),
        in_specs=[
            pl.BlockSpec((None, G, TQ, hd), lambda b, qi, hg: (b, hg, qi, 0)),  # q tile
            pl.BlockSpec((None, H, L, hd), lambda b, qi, hg: (b, 0, 0, 0)),     # K (per-b resident)
            pl.BlockSpec((None, H, L, hd), lambda b, qi, hg: (b, 0, 0, 0)),     # V (per-b resident)
            pl.BlockSpec((NG, G * hd, E), lambda b, qi, hg: (0, 0, 0)),         # Wo (resident)
            pl.BlockSpec((1, E), lambda b, qi, hg: (0, 0)),                     # bo (resident)
        ],
        out_specs=(
            pl.BlockSpec((None, TQ, E), lambda b, qi, hg: (b, qi, 0)),          # attention_value
            pl.BlockSpec((None, TQ, L), lambda b, qi, hg: (b, qi, 0)),          # attention_weight
        ),
        scratch_shapes=[pltpu.VMEM((TQ, E), jnp.float32)],                      # out-proj accumulator
        compiler_params=pltpu.CompilerParams(
            dimension_semantics=("parallel", "parallel", "arbitrary"),
            vmem_limit_bytes=vmem_limit,
        ),
        cost_estimate=cost,
    )(q, k, v, wo_g, bo)

    if Lp != L:
        val = val[:, :L]
        wgt = wgt[:, :L]
    return val, wgt


if __name__ == "__main__":
    # small shapes consistent with the module
    B, L, E, H = 2, 8, 32, 4

    key = jax.random.PRNGKey(0)
    k_x, k_win, k_bin, k_wout, k_bout = jax.random.split(key, 5)

    x = jax.random.normal(k_x, (B, L, E), dtype=jnp.float32)

    # deterministic parameters mirroring nn.MultiheadAttention shapes / xavier init
    bound_in = math.sqrt(6.0 / (3 * E + E))
    w_in = jax.random.uniform(k_win, (3 * E, E), jnp.float32, -bound_in, bound_in)
    b_in = 0.02 * jax.random.normal(k_bin, (3 * E,), jnp.float32)
    bound_out = math.sqrt(6.0 / (E + E))
    w_out = jax.random.uniform(k_wout, (E, E), jnp.float32, -bound_out, bound_out)
    b_out = 0.02 * jax.random.normal(k_bout, (E,), jnp.float32)

    fwd = jax.jit(partial(attention_forward, num_heads=H))
    attn_value, attn_weight = fwd(x, w_in, b_in, w_out, b_out)
    jax.block_until_ready((attn_value, attn_weight))

    assert attn_value.shape == (B, L, E)
    assert attn_weight.shape == (B, L, L)
    assert attn_value.dtype == x.dtype
    assert attn_weight.dtype == jnp.float32

    # Pure-JAX reference with torch.nn.MultiheadAttention inference semantics.
    def ref_mha(x, w_in, b_in, w_out, b_out, H):
        Bb, Ll, Ee = x.shape
        hdim = Ee // H
        qkv = jnp.einsum('ble,fe->blf', x, w_in) + b_in
        q, k, v = jnp.split(qkv, 3, axis=-1)
        q = q * (1.0 / math.sqrt(hdim))
        q = q.reshape(Bb, Ll, H, hdim).transpose(0, 2, 1, 3)
        k = k.reshape(Bb, Ll, H, hdim).transpose(0, 2, 1, 3)
        v = v.reshape(Bb, Ll, H, hdim).transpose(0, 2, 1, 3)
        s = jnp.einsum('bhqd,bhkd->bhqk', q, k)
        p = jax.nn.softmax(s, axis=-1)
        o = jnp.einsum('bhqk,bhkd->bhqd', p, v)
        o = o.transpose(0, 2, 1, 3).reshape(Bb, Ll, Ee)
        val = jnp.einsum('ble,fe->blf', o, w_out) + b_out
        return val, p.mean(axis=1)

    ref_val, ref_wgt = ref_mha(x, w_in, b_in, w_out, b_out, H)
    assert jnp.allclose(attn_value, ref_val, atol=2e-2, rtol=2e-2), \
        float(jnp.max(jnp.abs(attn_value - ref_val)))
    assert jnp.allclose(attn_weight, ref_wgt, atol=2e-2, rtol=2e-2), \
        float(jnp.max(jnp.abs(attn_weight - ref_wgt)))

    print("KERNEL_OK")
</pallas_src>

<mosaic_0001>
module attributes {stable_mosaic.version = 11 : i64} {
  func.func @_mha_core_kernel(%arg0: i32, %arg1: i32, %arg2: i32, %arg3: memref<1x4x8x8xbf16, #tpu.memory_space<vmem>>, %arg4: memref<1x4x8x8xbf16, #tpu.memory_space<vmem>>, %arg5: memref<1x4x8x8xbf16, #tpu.memory_space<vmem>>, %arg6: memref<1x32x32xbf16, #tpu.memory_space<vmem>>, %arg7: memref<1x32xf32, #tpu.memory_space<vmem>>, %arg8: memref<1x8x32xf32, #tpu.memory_space<vmem>>, %arg9: memref<1x8x8xf32, #tpu.memory_space<vmem>>, %arg10: memref<8x32xf32, #tpu.memory_space<vmem>>) attributes {dimension_semantics = [#tpu.dimension_semantics<parallel>, #tpu.dimension_semantics<parallel>, #tpu.dimension_semantics<arbitrary>], iteration_bounds = array<i64: 2, 1, 1>, scalar_prefetch = 0 : i64, scratch_operands = 1 : i64, tpu.core_type = #tpu.core_type<tc>, window_params = [{transform_indices = @transform_0, window_bounds = array<i64: 1, 4, 8, 8>}, {transform_indices = @transform_1, window_bounds = array<i64: 1, 4, 8, 8>}, {transform_indices = @transform_2, window_bounds = array<i64: 1, 4, 8, 8>}, {pipeline_mode = #tpu.pipeline_mode<synchronous>, transform_indices = @transform_3, window_bounds = array<i64: 1, 32, 32>}, {pipeline_mode = #tpu.pipeline_mode<synchronous>, transform_indices = @transform_4, window_bounds = array<i64: 1, 32>}, {transform_indices = @transform_5, window_bounds = array<i64: 1, 8, 32>}, {transform_indices = @transform_6, window_bounds = array<i64: 1, 8, 8>}]} {
    %c0_i32 = arith.constant 0 : i32
    %0 = arith.cmpi eq, %arg2, %c0_i32 : i32
    %1 = arith.extui %0 : i1 to i32
    %c0_i32_0 = arith.constant 0 : i32
    %2 = arith.cmpi ne, %1, %c0_i32_0 : i32
    scf.if %2 {
      %cst_30 = arith.constant 0.000000e+00 : f32
      %55 = vector.broadcast %cst_30 : f32 to vector<8x32xf32>
      %c0_31 = arith.constant 0 : index
      %c0_32 = arith.constant 0 : index
      %56 = vector.load %arg10[%c0_31, %c0_32] : memref<8x32xf32, #tpu.memory_space<vmem>>, vector<8x32xf32>
      tpu.vector_store %arg10[%c0_31, %c0_32], %55 {strides = array<i32>} : memref<8x32xf32, #tpu.memory_space<vmem>>, vector<8x32xf32>,
      %cst_33 = arith.constant 0.000000e+00 : f32
      %57 = vector.broadcast %cst_33 : f32 to vector<8x8xf32>
      %c0_34 = arith.constant 0 : index
      %c0_35 = arith.constant 0 : index
      %c0_36 = arith.constant 0 : index
      %58 = vector.load %arg9[%c0_34, %c0_35, %c0_36] : memref<1x8x8xf32, #tpu.memory_space<vmem>>, vector<1x8x8xf32>
      %59 = vector.shape_cast %58 : vector<1x8x8xf32> to vector<8x8xf32>
      %60 = vector.shape_cast %57 : vector<8x8xf32> to vector<1x8x8xf32>
      tpu.vector_store %arg9[%c0_34, %c0_35, %c0_36], %60 {strides = array<i32>} : memref<1x8x8xf32, #tpu.memory_space<vmem>>, vector<1x8x8xf32>,
    } else {
    }
    %c4_i32 = arith.constant 4 : i32
    %3 = arith.muli %arg2, %c4_i32 : i32
    %4 = tpu.assume_multiple %3, 4 : i32
    %c0 = arith.constant 0 : index
    %c0_1 = arith.constant 0 : index
    %c0_2 = arith.constant 0 : index
    %c0_3 = arith.constant 0 : index
    %5 = vector.load %arg3[%c0, %c0_1, %c0_2, %c0_3] : memref<1x4x8x8xbf16, #tpu.memory_space<vmem>>, vector<1x4x8x8xbf16>
    %6 = vector.shape_cast %5 : vector<1x4x8x8xbf16> to vector<4x8x8xbf16>
    %c0_4 = arith.constant 0 : index
    %7 = arith.index_cast %4 : i32 to index
    %c0_5 = arith.constant 0 : index
    %c0_6 = arith.constant 0 : index
    %8 = vector.load %arg4[%c0_4, %7, %c0_5, %c0_6] : memref<1x4x8x8xbf16, #tpu.memory_space<vmem>>, vector<1x4x8x8xbf16>
    %9 = vector.shape_cast %8 : vector<1x4x8x8xbf16> to vector<4x8x8xbf16>
    %c0_7 = arith.constant 0 : index
    %10 = arith.index_cast %4 : i32 to index
    %c0_8 = arith.constant 0 : index
    %c0_9 = arith.constant 0 : index
    %11 = vector.load %arg5[%c0_7, %10, %c0_8, %c0_9] : memref<1x4x8x8xbf16, #tpu.memory_space<vmem>>, vector<1x4x8x8xbf16>
    %12 = vector.shape_cast %11 : vector<1x4x8x8xbf16> to vector<4x8x8xbf16>
    "tpu.trace_start"() <{level = 10 : i32, message = "gqd,gkd->gqk"}> : () -> ()
    %cst = arith.constant dense<0.000000e+00> : vector<4x8x8xf32>
    %13 = tpu.matmul %6, %9, %cst {dimension_numbers = #tpu.dot_dimension_numbers<[2], [2], [1], [1], [0, 0, 0, 1, 1, 1], [0], [0]>} : vector<4x8x8xbf16>, vector<4x8x8xbf16>, vector<4x8x8xf32> -> vector<4x8x8xf32>
    "tpu.trace_stop"() : () -> ()
    %cst_10 = arith.constant dense<0xFF800000> : vector<4x8xf32>
    %14 = vector.multi_reduction <maximumf>, %13, %cst_10 [2] : vector<4x8x8xf32> to vector<4x8xf32>
    %15 = vector.shape_cast %14 : vector<4x8xf32> to vector<4x8x1xf32>
    %16 = vector.broadcast %15 : vector<4x8x1xf32> to vector<4x8x8xf32>
    %17 = arith.subf %13, %16 : vector<4x8x8xf32>
    %18 = math.exp %17 : vector<4x8x8xf32>
    %cst_11 = arith.constant dense<0.000000e+00> : vector<4x8xf32>
    %19 = vector.multi_reduction <add>, %18, %cst_11 [2] : vector<4x8x8xf32> to vector<4x8xf32>
    %20 = vector.shape_cast %19 : vector<4x8xf32> to vector<4x8x1xf32>
    %21 = tpu.reciprocal %20 {approx = true} : vector<4x8x1xf32> -> vector<4x8x1xf32>
    %22 = vector.broadcast %21 : vector<4x8x1xf32> to vector<4x8x8xf32>
    %23 = arith.mulf %18, %22 : vector<4x8x8xf32>
    %24 = arith.truncf %23 : vector<4x8x8xf32> to vector<4x8x8xbf16>
    "tpu.trace_start"() <{level = 10 : i32, message = "gqk,gkd->gqd"}> : () -> ()
    %cst_12 = arith.constant dense<0.000000e+00> : vector<4x8x8xf32>
    %25 = tpu.matmul %24, %12, %cst_12 {dimension_numbers = #tpu.dot_dimension_numbers<[2], [1], [1], [2], [0, 0, 0, 1, 1, 2], [0], [0]>} : vector<4x8x8xbf16>, vector<4x8x8xbf16>, vector<4x8x8xf32> -> vector<4x8x8xf32>
    "tpu.trace_stop"() : () -> ()
    %26 = vector.extract_strided_slice %25 {offsets = [0, 0, 0], sizes = [1, 8, 8], strides = [1, 1, 1]} : vector<4x8x8xf32> to vector<1x8x8xf32>
    %27 = vector.shape_cast %26 : vector<1x8x8xf32> to vector<8x8xf32>
    %28 = vector.extract_strided_slice %25 {offsets = [1, 0, 0], sizes = [1, 8, 8], strides = [1, 1, 1]} : vector<4x8x8xf32> to vector<1x8x8xf32>
    %29 = vector.shape_cast %28 : vector<1x8x8xf32> to vector<8x8xf32>
    %30 = vector.extract_strided_slice %25 {offsets = [2, 0, 0], sizes = [1, 8, 8], strides = [1, 1, 1]} : vector<4x8x8xf32> to vector<1x8x8xf32>
    %31 = vector.shape_cast %30 : vector<1x8x8xf32> to vector<8x8xf32>
    %32 = vector.extract_strided_slice %25 {offsets = [3, 0, 0], sizes = [1, 8, 8], strides = [1, 1, 1]} : vector<4x8x8xf32> to vector<1x8x8xf32>
    %33 = vector.shape_cast %32 : vector<1x8x8xf32> to vector<8x8xf32>
    %34 = tpu.concatenate %27, %29, %31, %33 in 1 : vector<8x8xf32>, vector<8x8xf32>, vector<8x8xf32>, vector<8x8xf32> -> vector<8x32xf32>
    %c0_13 = arith.constant 0 : index
    %c0_14 = arith.constant 0 : index
    %35 = vector.load %arg10[%c0_13, %c0_14] : memref<8x32xf32, #tpu.memory_space<vmem>>, vector<8x32xf32>
    %36 = arith.truncf %34 : vector<8x32xf32> to vector<8x32xbf16>
    %37 = arith.index_cast %arg2 : i32 to index
    %c0_15 = arith.constant 0 : index
    %c0_16 = arith.constant 0 : index
    %38 = vector.load %arg6[%37, %c0_15, %c0_16] : memref<1x32x32xbf16, #tpu.memory_space<vmem>>, vector<1x32x32xbf16>
    %39 = vector.shape_cast %38 : vector<1x32x32xbf16> to vector<32x32xbf16>
    %cst_17 = arith.constant dense<0.000000e+00> : vector<8x32xf32>
    %40 = tpu.matmul %36, %39, %cst_17 {dimension_numbers = #tpu.dot_dimension_numbers<[1], [0], [0], [1], [0, 0, 1, 1], [], []>} : vector<8x32xbf16>, vector<32x32xbf16>, vector<8x32xf32> -> vector<8x32xf32>
    %41 = arith.addf %35, %40 : vector<8x32xf32>
    %c0_18 = arith.constant 0 : index
    %c0_19 = arith.constant 0 : index
    %42 = vector.load %arg10[%c0_18, %c0_19] : memref<8x32xf32, #tpu.memory_space<vmem>>, vector<8x32xf32>
    tpu.vector_store %arg10[%c0_18, %c0_19], %41 {strides = array<i32>} : memref<8x32xf32, #tpu.memory_space<vmem>>, vector<8x32xf32>,
    %c0_20 = arith.constant 0 : index
    %c0_21 = arith.constant 0 : index
    %c0_22 = arith.constant 0 : index
    %43 = vector.load %arg9[%c0_20, %c0_21, %c0_22] : memref<1x8x8xf32, #tpu.memory_space<vmem>>, vector<1x8x8xf32>
    %44 = vector.shape_cast %43 : vector<1x8x8xf32> to vector<8x8xf32>
    %cst_23 = arith.constant dense<0.000000e+00> : vector<8x8xf32>
    %45 = vector.multi_reduction <add>, %23, %cst_23 [0] : vector<4x8x8xf32> to vector<8x8xf32>
    %cst_24 = arith.constant 2.500000e-01 : f32
    %46 = vector.broadcast %cst_24 : f32 to vector<8x8xf32>
    %47 = arith.mulf %45, %46 : vector<8x8xf32>
    %48 = arith.addf %44, %47 : vector<8x8xf32>
    %c0_25 = arith.constant 0 : index
    %c0_26 = arith.constant 0 : index
    %c0_27 = arith.constant 0 : index
    %49 = vector.load %arg9[%c0_25, %c0_26, %c0_27] : memref<1x8x8xf32, #tpu.memory_space<vmem>>, vector<1x8x8xf32>
    %50 = vector.shape_cast %49 : vector<1x8x8xf32> to vector<8x8xf32>
    %51 = vector.shape_cast %48 : vector<8x8xf32> to vector<1x8x8xf32>
    tpu.vector_store %arg9[%c0_25, %c0_26, %c0_27], %51 {strides = array<i32>} : memref<1x8x8xf32, #tpu.memory_space<vmem>>, vector<1x8x8xf32>,
    %c0_i32_28 = arith.constant 0 : i32
    %52 = arith.cmpi eq, %arg2, %c0_i32_28 : i32
    %53 = arith.extui %52 : i1 to i32
    %c0_i32_29 = arith.constant 0 : i32
    %54 = arith.cmpi ne, %53, %c0_i32_29 : i32
    scf.if %54 {
      %c0_30 = arith.constant 0 : index
      %c0_31 = arith.constant 0 : index
      %55 = vector.load %arg10[%c0_30, %c0_31] : memref<8x32xf32, #tpu.memory_space<vmem>>, vector<8x32xf32>
      %c0_32 = arith.constant 0 : index
      %c0_33 = arith.constant 0 : index
      %56 = vector.load %arg7[%c0_32, %c0_33] : memref<1x32xf32, #tpu.memory_space<vmem>>, vector<1x32xf32>
      %57 = vector.broadcast %56 : vector<1x32xf32> to vector<8x32xf32>
      %58 = arith.addf %55, %57 : vector<8x32xf32>
      %c0_34 = arith.constant 0 : index
      %c0_35 = arith.constant 0 : index
      %c0_36 = arith.constant 0 : index
      %59 = vector.load %arg8[%c0_34, %c0_35, %c0_36] : memref<1x8x32xf32, #tpu.memory_space<vmem>>, vector<1x8x32xf32>
      %60 = vector.shape_cast %59 : vector<1x8x32xf32> to vector<8x32xf32>
      %61 = vector.shape_cast %58 : vector<8x32xf32> to vector<1x8x32xf32>
      tpu.vector_store %arg8[%c0_34, %c0_35, %c0_36], %61 {strides = array<i32>} : memref<1x8x32xf32, #tpu.memory_space<vmem>>, vector<1x8x32xf32>,
    } else {
    }
    return
  }
  func.func @transform_0(%arg0: i32, %arg1: i32, %arg2: i32) -> (i32, i32, i32, i32) {
    %c0_i32 = arith.constant 0 : i32
    %c0_i32_0 = arith.constant 0 : i32
    return %arg0, %arg2, %arg1, %c0_i32 : i32, i32, i32, i32
  }
  func.func @transform_1(%arg0: i32, %arg1: i32, %arg2: i32) -> (i32, i32, i32, i32) {
    %c0_i32 = arith.constant 0 : i32
    %c0_i32_0 = arith.constant 0 : i32
    %c0_i32_1 = arith.constant 0 : i32
    %c0_i32_2 = arith.constant 0 : i32
    return %arg0, %c0_i32, %c0_i32_0, %c0_i32_1 : i32, i32, i32, i32
  }
  func.func @transform_2(%arg0: i32, %arg1: i32, %arg2: i32) -> (i32, i32, i32, i32) {
    %c0_i32 = arith.constant 0 : i32
    %c0_i32_0 = arith.constant 0 : i32
    %c0_i32_1 = arith.constant 0 : i32
    %c0_i32_2 = arith.constant 0 : i32
    return %arg0, %c0_i32, %c0_i32_0, %c0_i32_1 : i32, i32, i32, i32
  }
  func.func @transform_3(%arg0: i32, %arg1: i32, %arg2: i32) -> (i32, i32, i32) {
    %c0_i32 = arith.constant 0 : i32
    %c0_i32_0 = arith.constant 0 : i32
    %c0_i32_1 = arith.constant 0 : i32
    %c0_i32_2 = arith.constant 0 : i32
    return %c0_i32, %c0_i32_0, %c0_i32_1 : i32, i32, i32
  }
  func.func @transform_4(%arg0: i32, %arg1: i32, %arg2: i32) -> (i32, i32) {
    %c0_i32 = arith.constant 0 : i32
    %c0_i32_0 = arith.constant 0 : i32
    %c0_i32_1 = arith.constant 0 : i32
    return %c0_i32, %c0_i32_0 : i32, i32
  }
  func.func @transform_5(%arg0: i32, %arg1: i32, %arg2: i32) -> (i32, i32, i32) {
    %c0_i32 = arith.constant 0 : i32
    %c0_i32_0 = arith.constant 0 : i32
    return %arg0, %arg1, %c0_i32 : i32, i32, i32
  }
  func.func @transform_6(%arg0: i32, %arg1: i32, %arg2: i32) -> (i32, i32, i32) {
    %c0_i32 = arith.constant 0 : i32
    %c0_i32_0 = arith.constant 0 : i32
    return %arg0, %arg1, %c0_i32 : i32, i32, i32
  }
}

</mosaic_0001>

<bundles_post_ra>
// kernel: mul.9
= control target key start
LH: loop header
LB: loop body
LE: loop exit
PB: predicated region body
PF: predicated region fallthrough
CT: control target
= control target key end

     0   :  { %s34_s0 = inlined_call_operand.vmem [shape: f32[96], index: 0, kind: input, shape index: {}]   ;;  %s35_s1 = inlined_call_operand.vmem [shape: f32[96], index: 1, kind: input, shape index: {}]   ;;  %s36_s2 = inlined_call_operand.vmem [shape: f32[96], index: 2, kind: output, shape index: {}]  }
   0x1   :  { %v3_v0 = vld [vmem:[%s34_s0] sm:$0x1] }
   0x2   :  { %v4_v1 = vld [vmem:[%s35_s1] sm:$0x1] }
   0x3   :  { %v7_v2 = vmul.f32 %v4_v1, %v3_v0 }
   0x5   :  { %9 = vst [vmem:[%s36_s2] sm:$0x1] %v7_v2 }

// kernel: attention_forward.1
= control target key start
LH: loop header
LB: loop body
LE: loop exit
PB: predicated region body
PF: predicated region fallthrough
CT: control target
= control target key end

     0   :  { %12 = vsyncpa [#allocation4], 0  ;;  %s1659_s0 = inlined_call_operand.vmem [shape: bf16[2,4,8,8], index: 0, kind: input, shape index: {}]   ;;  %s1660_s1 = inlined_call_operand.vmem [shape: bf16[2,4,8,8], index: 1, kind: input, shape index: {}]   ;;  %s1661_s2 = inlined_call_operand.vmem [shape: bf16[2,4,8,8], index: 2, kind: input, shape index: {}]   ;;  %s1662_s3 = inlined_call_operand.vmem [shape: bf16[1,32,32], index: 3, kind: input, shape index: {}]   ;;  %s1663_s4 = inlined_call_operand.vmem [shape: f32[1,32], index: 4, kind: input, shape index: {}]   ;;  %s1664_s5 = inlined_call_operand.hbm [shape: f32[2,8,32], index: 5, kind: output, shape index: {0}]   ;;  %s1665_s6 = inlined_call_operand.hbm [shape: f32[2,8,8], index: 6, kind: output, shape index: {1}]  }
   0x1   :  { %14 = vsyncpa [#allocation4 + $0x1], 0 }
   0x2   :  { %15 = vsyncpa [#allocation6], 0 }
   0x3   :  { %17 = vsyncpa [#allocation6 + $0x1], 0  ;;  %s1425_s21 = smov 0   ;;  %s1427_s22 = smov 0  }
   0x4   :  { %s1429_s23 = smov 0   ;;  %s1431_s24 = smov 0  }
   0x5   :  { %s1433_s25 = smov 0   ;;  %s1435_s26 = smov 0  }
   0x6 LB: > { %s1079_s27 = sadd.s32 4294967295, %s1381_s26   ;;  %s1080_s28 = sadd.s32 4294967294, %s1381_s26   ;;  %s1381_s26 = sphi %s1435_s26, %s23_s26   ;;  %s1377_s25 = sphi %s1433_s25, %s1672_s25   ;;  %s1373_s24 = sphi %s1431_s24, %s1671_s24   ;;  %s1369_s23 = sphi %s1429_s23, %s1670_s23   ;;  %s1365_s22 = sphi %s1427_s22, %s1669_s22   ;;  %s1361_s21 = sphi %s1425_s21, %s1668_s21  }
   0x7   : > { %s42_s29 = sadd.s32 1, %s1377_s25  ;;  %s175_s30 = sadd.s32 1, %s1369_s23 }
   0x8   : > { %p44_p0 = scmp.ge.s32.totalorder %s42_s29, 2  ;;  %p185_p1 = scmp.ne.s32.totalorder %s1369_s23, %s1365_s22 }
   0x9   : > { %p186_p2 = scmp.eq.s32.totalorder %s1079_s27, 1  ;;  %p191_p3 = scmp.ne.s32.totalorder %s1365_s22, %s1361_s21 }
   0xa   : > { %s1674_s29 = smov (%p44_p0, %s42_s29), 0  ;;  %p192_p5 = scmp.eq.s32.totalorder %s1080_s28, 1 }
   0xb   : > { %p1465_p4 = por %p186_p2, %p185_p1  ;;  %s170_s8 = ssub.s32 %s1377_s25, %s1674_s29 }
   0xc   : > { %p1083_p6 = scmp.ge.s32.totalorder %s1381_s26, 1  ;;  %p173_p7 = scmp.eq.s32.totalorder %s170_s8, 0 }
   0xd   : > { %p1472_p8 = por %p192_p5, %p191_p3  ;;  %p276_p9 = scmp.lt.s32.totalorder %s1381_s26, 3 }
   0xe   : > { %s1478_s10 = scalar_select %p173_p7, %s1369_s23, %s175_s30  }
   0xf   : > { %p277_p10 = pnand %p1083_p6, %p276_p9 }
  0x10   : > { %p329_p11 = scmp.lt.s32.totalorder (!%p277_p10), %s1373_s24, 1  ;;  %v1383_v0 = vmov (!%p277_p10), 0.0   ;;  %vm1384_vm0 = vmmov (!%p277_p10), 0   ;;  %vm358_vm1 = vcmask (!%p277_p10), 64512   ;;  %vm613_vm2 = vcmask (!%p277_p10), 1043456   ;;  %s1533_s28 = sand.u32 (!%p277_p10), 1, %s1365_s22  }
  0x11   : > { %280 = sbr.rel (%p277_p10) target bundleno = 1145 (0x479), region = 40  ;;  %1132 = vmatprep.subr.bf16.mxu0 (!%p277_p10), %v1383_v0  ;;  %1138 = vmatprep.subr.bf16.mxu1 (!%p277_p10), %v1383_v0  ;;  %s1084_s30 = sshll.u32 (!%p277_p10), %s1533_s28, 3  ;;  %vm356_vm3 = vcmask (!%p277_p10), 261120   ;;  %vm808_vm4 = vcmask (!%p277_p10), 130048   ;;  %vm810_vm5 = vcmask (!%p277_p10), 195584  }
  0x12   : > { %1134 = vmatprep.mubr.msk.bf16.mxu0 (!%p277_p10), %vm1384_vm0, %v1383_v0  ;;  %1140 = vmatprep.mubr.msk.bf16.mxu1 (!%p277_p10), %vm1384_vm0, %v1383_v0  ;;  %s1538_s8 = scalar_lea.vmem (!%p277_p10), [#allocation5], %s1084_s30  ;;  %357 = vst.msk [vmem:[#allocation2] sm:$0xff] (!%p277_p10), %vm356_vm3, %v1383_v0  ;;  %s1386_s16 = smov (!%p277_p10), 16  }
  0x13   : > { %359 = vst.msk [vmem:[%s1538_s8] sm:$0xff] (!%p277_p10), %vm358_vm1, %v1383_v0  ;;  %s1387_s17 = smov (!%p277_p10), 24   ;;  %s1388_s14 = smov (!%p277_p10), [#allocation5]  }
  0x18   : > { %s330_s11 = scalar_select %p329_p11, %s1373_s24, 1 }
  0x1a   : > { %s1488_s12 = sshll.u32 %s330_s11, 4  ;;  %s936_s11 = sshll.u32 %s1538_s8, 4  ;;  %s937_s11 = int_to_ptr.vmem [resolvable:$true] %s936_s11 }
  0x1b   : > { %s345_s15 = scalar_lea.vmem %s1660_s1, %s1488_s12  ;;  %s339_s18 = scalar_lea.vmem %s1659_s0, %s1488_s12 }
  0x1c   : > { %v367_v1 = vld [vmem:[%s345_s15] sm:$0xf]  ;;  %v368_v2 = vld [vmem:[%s345_s15 + $0x4] sm:$0xf]  ;;  %v369_v5 = vld [vmem:[%s345_s15 + $0x8] sm:$0xf]  ;;  %s350_s27 = scalar_lea.vmem %s1661_s2, %s1488_s12 }
  0x1d   : > { %v382_v3 = vsel %vm358_vm1, %v367_v1, 0  ;;  %v428_v4 = vsel %vm358_vm1, %v368_v2, 0  ;;  %v370_v6 = vld [vmem:[%s345_s15 + $0xc] sm:$0xf]  ;;  %v361_v7 = vld [vmem:[%s339_s18] sm:$0xf] }
  0x1e   : > { %1133 = vmatpush3.bf16.xpose.msra.mxu0 %v382_v3  ;;  %1139 = vmatpush3.bf16.xpose.msra.mxu1 %v428_v4  ;;  %v362_v8 = vld [vmem:[%s339_s18 + $0x4] sm:$0xf]  ;;  %v474_v9 = vsel %vm358_vm1, %v369_v5, 0  ;;  %v520_v10 = vsel %vm358_vm1, %v370_v6, 0  ;;  %v363_v11 = vld [vmem:[%s339_s18 + $0x8] sm:$0xf] }
  0x1f   : > { %1144 = vmatprep.subr.bf16.mxu0 %v1383_v0  ;;  %1150 = vmatprep.subr.bf16.mxu1 %v1383_v0  ;;  %v364_v12 = vld [vmem:[%s339_s18 + $0xc] sm:$0xf]  ;;  %v373_v53 = vld [vmem:[%s350_s27] sm:$0xf]  ;;  %v374_v55 = vld [vmem:[%s350_s27 + $0x4] sm:$0xf] }
  0x20   : > { %v615_v54 = vsel %vm613_vm2, %v373_v53, 0  ;;  %v661_v56 = vsel %vm613_vm2, %v374_v55, 0  ;;  %v375_v57 = vld [vmem:[%s350_s27 + $0x8] sm:$0xf]  ;;  %v376_v59 = vld [vmem:[%s350_s27 + $0xc] sm:$0xf] }
  0x21   : > { %v707_v58 = vsel %vm613_vm2, %v375_v57, 0  ;;  %v753_v60 = vsel %vm613_vm2, %v376_v59, 0  ;;  %s1385_s15 = smov 8   ;;  %s1106_s18 = sshll.u32 %s1373_s24, 7 }
  0x22   : > { %s1578_s27 = scalar_lea.hbm %s1665_s6, %s1106_s18  ;;  %s908_s12 = scalar_lea.sflag [#allocation6], %s1533_s28 }
  0x23   : > { %s1271_s13 = scalar_lea.vmem %s937_s11, 128 }
  0x24   : > { %p1272_p12 = scmp.ne.s32.totalorder %s937_s11, %s1271_s13 }
  0x25   : > { %1135 = vmatmul.mubr.msk.bf16.vlgmr.msra.gmra.mrb[0].mxu0 %vm358_vm1, %v361_v7  ;;  %1141 = vmatmul.mubr.msk.bf16.vlgmr.msra.gmra.mrb[0].mxu1 %vm358_vm1, %v362_v8 }
  0x26   : > { %1145 = vmatpush3.bf16.xpose.msra.mxu0 %v474_v9  ;;  %1151 = vmatpush3.bf16.xpose.msra.mxu1 %v520_v10  ;;  %p1273_p13 = pnand %p1272_p12, %p1465_p4 }
  0x27   : > { %1146 = vmatprep.mubr.msk.bf16.mxu0 %vm1384_vm0, %v1383_v0  ;;  %1152 = vmatprep.mubr.msk.bf16.mxu1 %vm1384_vm0, %v1383_v0 }
  0x28   : > { %1156 = vmatprep.subr.bf16.mxu0 %v1383_v0  ;;  %1162 = vmatprep.subr.bf16.mxu1 %v1383_v0  ;;  %p1274_p0 = pneg %p1273_p13 }
  0x2d   : > { %1147 = vmatmul.mubr.msk.bf16.vlgmr.msra.gmra.mrb[4].mxu0 %vm358_vm1, %v363_v11  ;;  %1153 = vmatmul.mubr.msk.bf16.vlgmr.msra.gmra.mrb[4].mxu1 %vm358_vm1, %v364_v12 }
  0x2e   : > { %1158 = vmatprep.mubr.msk.bf16.mxu0 %vm1384_vm0, %v1383_v0  ;;  %1164 = vmatprep.mubr.msk.bf16.mxu1 %vm1384_vm0, %v1383_v0 }
  0x2f   : > { %1157 = vmatpush3.bf16.msra.mxu0 %v615_v54  ;;  %1163 = vmatpush3.bf16.msra.mxu1 %v661_v56 }
  0x30   : > { %1168 = vmatprep.subr.bf16.mxu0 %v1383_v0  ;;  %1174 = vmatprep.subr.bf16.mxu1 %v1383_v0 }
  0xf8   : > { %v418_v13 = vpop.f32.mrb[0].mxu0  ;;  %v464_v14 = vpop.f32.mrb[0].mxu1 }
  0xf9   : > { %v1136_v15 = vpop.f32.mrb[1].mxu0  ;;  %v562_v16 = vsel %vm358_vm1, %v418_v13, -inf  ;;  %v1142_v17 = vpop.f32.mrb[1].mxu1  ;;  %v565_v22 = vsel %vm358_vm1, %v464_v14, -inf }
  0xfa   : > { %563 = vmax.xlane.f32.xlu0 %v562_v16  ;;  %v421_v18 = vpop.f32.mrb[2].mxu0  ;;  %v467_v19 = vpop.f32.mrb[2].mxu1 }
  0xfb   : > { %v1137_v20 = vpop.f32.mrb[3].mxu0  ;;  %v1143_v21 = vpop.f32.mrb[3].mxu1 }
  0xfc   : > { %v878_v21 = vld [vmem:[%s1538_s8] sm:$0xff] }
  0xfe   : > { %566 = vmax.xlane.f32.xlu0 %v565_v22 }
 0x100   : > { %v510_v23 = vpop.f32.mrb[4].mxu0  ;;  %v556_v24 = vpop.f32.mrb[4].mxu1 }
 0x101   : > { %v1148_v25 = vpop.f32.mrb[5].mxu0  ;;  %v568_v26 = vsel %vm358_vm1, %v510_v23, -inf  ;;  %v1154_v27 = vpop.f32.mrb[5].mxu1  ;;  %v571_v32 = vsel %vm358_vm1, %v556_v24, -inf }
 0x102   : > { %569 = vmax.xlane.f32.xlu1 %v568_v26  ;;  %v513_v28 = vpop.f32.mrb[6].mxu0  ;;  %v559_v29 = vpop.f32.mrb[6].mxu1  ;;  %v1254_v25 = vld [vmem:[%s1662_s3 + $0x8] sm:$0xff]  }
 0x103   : > { %v1149_v30 = vpop.f32.mrb[7].mxu0  ;;  %v1155_v31 = vpop.f32.mrb[7].mxu1 }
 0x106   : > { %572 = vmax.xlane.f32.xlu1 %v571_v32 }
 0x187   : > { %v564_v33 = vpop.xlane.xlu0 %563 }
 0x188   : > { %v574_v34 = vsub.f32 %v418_v13, %v564_v33 }
 0x18a   : > { %v578_v35 = vmul.f32 1.442695, %v574_v34 }
 0x18b   : > { %v567_v36 = vpop.xlane.xlu0 %566 }
 0x18c   : > { %1255 = vpow2.f32 %v578_v35  ;;  %v575_v37 = vsub.f32 %v464_v14, %v567_v36 }
 0x18e   : > { %v580_v38 = vmul.f32 1.442695, %v575_v37 }
 0x18f   : > { %v570_v39 = vpop.xlane.xlu1 %569 }
 0x190   : > { %1257 = vpow2.f32 %v580_v38  ;;  %v576_v40 = vsub.f32 %v510_v23, %v570_v39 }
 0x192   : > { %v582_v41 = vmul.f32 1.442695, %v576_v40 }
 0x193   : > { %v573_v42 = vpop.xlane.xlu1 %572 }
 0x194   : > { %1259 = vpow2.f32 %v582_v41  ;;  %v577_v43 = vsub.f32 %v556_v24, %v573_v42  ;;  %v1253_v24 = vld [vmem:[%s1662_s3] sm:$0xff]  }
 0x196   : > { %v1256_v44 = vpop.eup %1255  ;;  %v584_v45 = vmul.f32 1.442695, %v577_v43 }
 0x197   : > { %v586_v46 = vsel %vm358_vm1, %v1256_v44, 0.0 }
 0x198   : > { %1261 = vpow2.f32 %v584_v45  ;;  %587 = vadd.xlane.f32.xlu0 %v586_v46 }
 0x19a   : > { %v1258_v47 = vpop.eup %1257 }
 0x19b   : > { %v589_v48 = vsel %vm358_vm1, %v1258_v47, 0.0 }
 0x19c   : > { %590 = vadd.xlane.f32.xlu1 %v589_v48 }
 0x19e   : > { %v1260_v49 = vpop.eup %1259 }
 0x19f   : > { %v592_v50 = vsel %vm358_vm1, %v1260_v49, 0.0 }
 0x1a0   : > { %593 = vadd.xlane.f32.xlu0 %v592_v50 }
 0x1a2   : > { %v1262_v51 = vpop.eup %1261 }
 0x1a3   : > { %v595_v52 = vsel %vm358_vm1, %v1262_v51, 0.0 }
 0x1a4   : > { %596 = vadd.xlane.f32.xlu1 %v595_v52 }
 0x225   : > { %v588_v61 = vpop.xlane.xlu0 %587 }
 0x226   : > { %1263 = vrcp.f32 %v588_v61 }
 0x229   : > { %v591_v62 = vpop.xlane.xlu1 %590 }
 0x22a   : > { %1265 = vrcp.f32 %v591_v62 }
 0x22d   : > { %v594_v63 = vpop.xlane.xlu0 %593 }
 0x22e   : > { %1267 = vrcp.f32 %v594_v63 }
 0x230   : > { %v1264_v1 = vpop.eup %1263 }
 0x231   : > { %v602_v2 = vmul.f32 %v1264_v1, %v1256_v44  ;;  %v597_v3 = vpop.xlane.xlu1 %596 }
 0x232   : > { %1269 = vrcp.f32 %v597_v3 }
 0x233   : > { %v606_v4 = vpack.c.bf16 %v602_v2, %v602_v2  ;;  %v879_v11 = vsel %vm358_vm1, %v602_v2, 0.0 }
 0x234   : > { %v1266_v5 = vpop.eup %1265 }
 0x235   : > { %v603_v6 = vmul.f32 %v1266_v5, %v1258_v47  ;;  %1159 = vmatmul.mubr.msk.bf16.vlgmr.msra.gmra.mrb[8].mxu0 %vm358_vm1, %v606_v4 }
 0x236   : > { %1169 = vmatpush3.bf16.msra.mxu0 %v707_v58  ;;  %1170 = vmatprep.mubr.msk.bf16.mxu0 %vm1384_vm0, %v1383_v0 }
 0x237   : > { %v607_v7 = vpack.c.bf16 %v603_v6, %v603_v6  ;;  %1180 = vmatprep.subr.bf16.mxu0 %v1383_v0  ;;  %v880_v9 = vsel %vm358_vm1, %v603_v6, 0.0 }
 0x238   : > { %v1268_v8 = vpop.eup %1267  ;;  %v881_v15 = vadd.f32 %v880_v9, %v879_v11 }
 0x239   : > { %v604_v10 = vmul.f32 %v1268_v8, %v1260_v49  ;;  %1165 = vmatmul.mubr.msk.bf16.vlgmr.msra.gmra.mrb[8].mxu1 %vm358_vm1, %v607_v7 }
 0x23a   : > { %1175 = vmatpush3.bf16.msra.mxu1 %v753_v60  ;;  %1176 = vmatprep.mubr.msk.bf16.mxu1 %vm1384_vm0, %v1383_v0 }
 0x23b   : > { %v882_v12 = vsel %vm358_vm1, %v604_v10, 0.0  ;;  %v608_v13 = vpack.c.bf16 %v604_v10, %v604_v10 }
 0x23c   : > { %v1270_v14 = vpop.eup %1269  ;;  %v883_v17 = vadd.f32 %v882_v12, %v881_v15 }
 0x23d   : > { %v605_v16 = vmul.f32 %v1270_v14, %v1262_v51  ;;  %1171 = vmatmul.mubr.msk.bf16.vlgmr.msra.gmra.mrb[12].mxu0 %vm358_vm1, %v608_v13 }
 0x23e   : > { %1184 = vmatprep.mubr.msk.bf16.mxu0 %vm1384_vm0, %v1383_v0  ;;  %1181 = vmatpush3.bf16.msra.mxu0 %v1253_v24 }
 0x23f   : > { %v884_v18 = vsel %vm358_vm1, %v605_v16, 0.0  ;;  %v609_v19 = vpack.c.bf16 %v605_v16, %v605_v16  ;;  %1182 = vmatprep.subr.bf16.mxu0 %v1383_v0 }
 0x240   : > { %v885_v20 = vadd.f32 %v884_v18, %v883_v17 }
 0x241   : > { %1177 = vmatmul.mubr.msk.bf16.vlgmr.msra.gmra.mrb[12].mxu1 %vm358_vm1, %v609_v19 }
 0x242   : > { %v886_v22 = vmul.f32 0.25, %v885_v20  ;;  %1183 = vmatpush3.bf16.msra.mxu0 %v1254_v25 }
 0x244   : > { %v887_v23 = vadd.f32 %v886_v22, %v878_v21 }
 0x246   : > { %888 = vst.msk [vmem:[%s1538_s8] sm:$0xff] %vm358_vm1, %v887_v23 }
 0x308   : > { %v651_v26 = vpop.f32.mrb[8].mxu0 }
 0x309   : > { %v1160_v27 = vpop.f32.mrb[9].mxu0 }
 0x30a   : > { %v654_v28 = vpop.f32.mrb[10].mxu0 }
 0x30b   : > { %v1161_v29 = vpop.f32.mrb[11].mxu0 }
 0x30c   : > { %v697_v30 = vpop.f32.mrb[8].mxu1 }
 0x30d   : > { %796 = vrot.lane.b32.xlu0 %v697_v30, %s1385_s15  ;;  %v1166_v31 = vpop.f32.mrb[9].mxu1  ;;  %s1275_s15 = sshll.u32 %s1388_s14, 4  ;;  %s1276_s15 = int_to_ptr.vmem [resolvable:$false] %s1275_s15 }
 0x30e   : > { %v700_v32 = vpop.f32.mrb[10].mxu1  ;;  %p1278_p1 = scmp.lt.s32.totalorder %s937_s11, %s1276_s15 }
 0x30f   : > { %v1167_v33 = vpop.f32.mrb[11].mxu1 }
 0x310   : > { %v743_v34 = vpop.f32.mrb[12].mxu0 }
 0x311   : > { %800 = vrot.lane.b32.xlu1 %v743_v34, %s1386_s16  ;;  %v1172_v35 = vpop.f32.mrb[13].mxu0  ;;  %s1277_s16 = scalar_lea.vmem %s1276_s15, 256 }
 0x312   : > { %v746_v36 = vpop.f32.mrb[14].mxu0  ;;  %p1279_p2 = scmp.lt.s32.totalorder %s1277_s16, %s1271_s13 }
 0x313   : > { %v1173_v37 = vpop.f32.mrb[15].mxu0 }
 0x314   : > { %v789_v38 = vpop.f32.mrb[12].mxu1  ;;  %p1280_p3 = por %p1279_p2, %p1278_p1 }
 0x315   : > { %v1178_v39 = vpop.f32.mrb[13].mxu1  ;;  %804 = vrot.lane.b32.xlu1 %v789_v38, %s1387_s17 }
 0x316   : > { %v792_v0 = vpop.f32.mrb[14].mxu1  ;;  %p1281_p5 = pnand %p1280_p3, %p1274_p0 }
 0x317   : > { %v1179_v40 = vpop.f32.mrb[15].mxu1 }
 0x37f   : > { %v797_v41 = vpop.permute.xlu0 %796 }
 0x380   : > { %v807_v43 = vsel %vm358_vm1, %v651_v26, %v797_v41 }
 0x383   : > { %v801_v42 = vpop.permute.xlu1 %800 }
 0x384   : > { %v809_v44 = vsel %vm808_vm4, %v807_v43, %v801_v42 }
 0x387   : > { %v805_v45 = vpop.permute.xlu1 %804 }
 0x388   : > { %v811_v46 = vsel %vm810_vm5, %v809_v44, %v805_v45 }
 0x389   : > { %v813_v47 = vpack.c.bf16 %v811_v46, %v811_v46 }
 0x38b   : > { %1185 = vmatmul.mubr.msk.bf16.vlgmr.msra.gmra.mrb[16].mxu0 %vm356_vm3, %v813_v47 }
 0x38c   : > { %1284 = shalt.err (!%p1281_p5)
}
 0x38d   : > { %s1285_s8 = scalar_lea.hbm %s1578_s27, 128  ;;  %s1289_s20 = scalar_lea.hbm %s1665_s6, 256 }
 0x38e   : > { %p1286_p6 = scmp.ne.s32.totalorder %s1578_s27, %s1285_s8  ;;  %p1290_p10 = scmp.lt.u32.totalorder %s1578_s27, %s1665_s6 }
 0x38f   : > { %p1291_p11 = scmp.lt.u32.totalorder %s1289_s20, %s1285_s8  ;;  %p1293_p13 = scmp.lt.u32.totalorder %s1285_s8, %s1578_s27 }
 0x390   : > { %p1287_p7 = pnand %p1286_p6, %p1465_p4 }
 0x391   : > { %p1292_p12 = por %p1291_p11, %p1290_p10 }
 0x392   : > { %p1288_p9 = pneg %p1287_p7 }
 0x393   : > { %p1294_p0 = por %p1293_p13, %p1292_p12 }
 0x395   : > { %p1295_p1 = pnand %p1294_p0, %p1288_p9 }
 0x397   : > { %1298 = shalt.err (!%p1295_p1)
}
 0x398   : > { %1189 = dma.vmem_to_hbm [thread:$0]  (%p1465_p4), %s937_s11, 128, %s1578_s27, %s908_s12   ;;  %v812_v48 = vld [vmem:[#allocation2] sm:$0xff] }
 0x399   : > { %v1103_v54 = vld [vmem:[%s1663_s4] ss:$0 sm:$0xff]  ;;  %s320_s8 = scalar_lea.vmem [#allocation3], %s1084_s30  ;;  %s1610_s12 = scalar_lea.hbm %s1664_s5, %s1106_s18 }
 0x39a   : > { %s922_s17 = sshll.u32 %s320_s8, 4  ;;  %s903_s19 = scalar_lea.sflag [#allocation4], %s1533_s28  ;;  %s1612_s17 = int_to_ptr.vmem [resolvable:$true] %s922_s17 }
 0x39b   : > { %s1299_s20 = scalar_lea.vmem %s1612_s17, 128  ;;  %s1389_s30 = smov [#allocation3]  }
 0x39c   : > { %p1300_p2 = scmp.ne.s32.totalorder %s1612_s17, %s1299_s20  ;;  %s1303_s24 = sshll.u32 %s1389_s30, 4  ;;  %s1304_s24 = int_to_ptr.vmem [resolvable:$false] %s1303_s24 }
 0x39d   : > { %s1305_s14 = scalar_lea.vmem %s1304_s24, 256  ;;  %p1306_p6 = scmp.lt.s32.totalorder %s1612_s17, %s1304_s24 }
 0x39e   : > { %p1301_p3 = pnand %p1300_p2, %p1465_p4  ;;  %p1307_p7 = scmp.lt.s32.totalorder %s1305_s14, %s1299_s20 }
 0x3a0   : > { %p1302_p5 = pneg %p1301_p3  ;;  %p1308_p9 = por %p1307_p7, %p1306_p6 }
 0x3a2   : > { %p1309_p10 = pnand %p1308_p9, %p1302_p5 }
 0x45e   : > { %v870_v49 = vpop.f32.mrb[16].mxu0 }
 0x45f   : > { %v876_v50 = vadd.f32 %v870_v49, %v812_v48  ;;  %v1186_v51 = vpop.f32.mrb[17].mxu0 }
 0x460   : > { %v873_v52 = vpop.f32.mrb[18].mxu0 }
 0x461   : > { %877 = vst.msk [vmem:[#allocation2] sm:$0xff] %vm356_vm3, %v876_v50  ;;  %v1187_v53 = vpop.f32.mrb[19].mxu0 }
 0x468   : > { %v892_v55 = vld [vmem:[#allocation2] sm:$0xff] }
 0x469   : > { %v900_v56 = vadd.f32 %v1103_v54, %v892_v55 }
 0x46b   : > { %901 = vst.msk [vmem:[%s320_s8] sm:$0xff] %vm356_vm3, %v900_v56 }
 0x46c   : > { %1312 = shalt.err (!%p1309_p10)
}
 0x46d   : > { %s1313_s28 = scalar_lea.hbm %s1610_s12, 128  ;;  %s1317_s13 = scalar_lea.hbm %s1664_s5, 256 }
 0x46e   : > { %p1314_p11 = scmp.ne.s32.totalorder %s1610_s12, %s1313_s28  ;;  %p1318_p0 = scmp.lt.u32.totalorder %s1610_s12, %s1664_s5 }
 0x46f   : > { %p1319_p1 = scmp.lt.u32.totalorder %s1317_s13, %s1313_s28  ;;  %p1321_p3 = scmp.lt.u32.totalorder %s1313_s28, %s1610_s12 }
 0x470   : > { %p1315_p12 = pnand %p1314_p11, %p1465_p4 }
 0x471   : > { %p1320_p2 = por %p1319_p1, %p1318_p0 }
 0x472   : > { %p1316_p13 = pneg %p1315_p12 }
 0x473   : > { %p1322_p5 = por %p1321_p3, %p1320_p2 }
 0x475   : > { %p1323_p6 = pnand %p1322_p5, %p1316_p13 }
 0x477   : > { %1326 = shalt.err (!%p1323_p6)
}
 0x478   : > { %1188 = dma.vmem_to_hbm [thread:$0]  (%p1465_p4), %s1612_s17, 128, %s1610_s12, %s903_s19  }
 0x479 PF: > { %p1199_p7 = scmp.ge.s32.totalorder %s1381_s26, 2  ;;  %s948_s27 = sand.u32 1, %s1361_s21  }
 0x47a   : > { %s949_s11 = scalar_lea.sflag [#allocation4], %s948_s27 }
 0x47b   : > { %p1193_p9 = pnand %p1199_p7, %p1472_p8 }
 0x47d   : > { %1352 = dma.done.wait (!%p1193_p9), %s949_s11, 128  }
 0x47e   : > { %1354 = vsyncadd (!%p1193_p9), %s949_s11, 4294967168  ;;  %s958_s20 = scalar_lea.sflag [#allocation6], %s948_s27 }
 0x47f   : > { %1356 = dma.done.wait (!%p1193_p9), %s958_s20, 128  }
 0x480   : > { %1358 = vsyncadd (!%p1193_p9), %s958_s20, 4294967168  ;;  %s23_s26 = sadd.s32 1, %s1381_s26   ;;  %s1668_s21 = smov %s1365_s22 }
 0x481   : > { %p20_p10 = scmp.ge.s32.totalorder %s23_s26, 4   ;;  %s1669_s22 = smov %s1369_s23 }
 0x482   : > { %s1670_s23 = smov %s1478_s10  ;;  %s1671_s24 = smov %s1377_s25 }
 0x483   : > { %s1672_s25 = smov %s1674_s29  ;;  %22 = sbr.rel (!%p20_p10) target bundleno = 6 (0x6), region = 109 }
 0x48a   :  { %963 = vsyncpa [#allocation4], 1 }
 0x48b   :  { %965 = vsyncpa [#allocation4 + $0x1], 1 }
 0x48c   :  { %966 = vsyncpa [#allocation6], 1 }
 0x48d   :  { %968 = vsyncpa [#allocation6 + $0x1], 1 }

</bundles_post_ra>
